<compile_context>
chip_gen: v7x
topology: tpu7x:2x2x1
jax: 0.10.0
libtpu: 0.0.40
codegen_flags: <defaults>
</compile_context>

<pallas_src>
import jax
import jax.numpy as jnp
from jax import lax
from jax.experimental import pallas as pl
from jax.experimental.pallas import tpu as pltpu

INPUT_DIM = 512        # DEFAULT_CONFIG['fusion_hidden_dim']
NUM_CLASSES = 2        # DEFAULT_CONFIG['num_question_filter_classes']
_LANE = 128            # lane width: pad the class axis up to this
_SUBLANE = 8


def _round_up(x, m):
    return ((x + m - 1) // m) * m


def _linear_kernel(x_ref, wt_ref, b_ref, o_ref):
    # x_ref : (tm, D)     f32
    # wt_ref: (Cp, D)     f32   (lane-dense, PyTorch (out, in) layout, zero-padded rows)
    # b_ref : (1, Cp)     f32   (zero-padded)
    # o_ref : (tm, Cp)    f32   (lane-dense output slab)
    acc = lax.dot_general(
        x_ref[...], wt_ref[...],
        dimension_numbers=(((1,), (1,)), ((), ())),   # contract shared D axis
        preferred_element_type=jnp.float32,
    )
    o_ref[...] = acc + b_ref[...]


def question_filter_head(x, w_pt, b, *, block_b=1024):
    """y = x @ w_pt.T + b  via a Pallas TPU kernel.

    x    : (B, D) float32   fused features
    w_pt : (C, D) float32   PyTorch nn.Linear weight (out_features, in_features)
    b    : (C,)   float32   bias
    returns: (B, C) float32
    """
    B, D = x.shape
    C = w_pt.shape[0]

    # Lane-dense padding of the class axis (zero weights/bias -> exact result).
    c_pad = _round_up(max(C, 1), _LANE)
    w_p = jnp.zeros((c_pad, D), jnp.float32).at[:C, :].set(w_pt.astype(jnp.float32))
    b_p = jnp.zeros((1, c_pad), jnp.float32).at[0, :C].set(b.astype(jnp.float32))

    # Batch tiling: a multiple of the sublane (8); cap tile size for VMEM safety
    # on all generations (tm=1024 f32 x tile ~= 2 MiB, double-buffered ~4 MiB).
    tm = min(block_b, _round_up(B, _SUBLANE))
    b_pad = _round_up(B, tm)
    x_p = x if b_pad == B else jnp.pad(x, ((0, b_pad - B), (0, 0)))

    out = pl.pallas_call(
        _linear_kernel,
        out_shape=jax.ShapeDtypeStruct((b_pad, c_pad), jnp.float32),
        grid=(b_pad // tm,),
        in_specs=[
            pl.BlockSpec((tm, D), lambda i: (i, 0)),       # x tile marches over batch
            pl.BlockSpec((c_pad, D), lambda i: (0, 0)),    # weight resident in VMEM
            pl.BlockSpec((1, c_pad), lambda i: (0, 0)),    # bias resident in VMEM
        ],
        out_specs=pl.BlockSpec((tm, c_pad), lambda i: (i, 0)),
        compiler_params=pltpu.CompilerParams(
            # Batch tiles are independent -> parallel (sharded across v7x's 2 TCs,
            # neutral on v5e/v6e).
            dimension_semantics=("parallel",),
        ),
    )(x_p, w_p, b_p)

    return out[:B, :C]


if __name__ == "__main__":
    key = jax.random.PRNGKey(0)
    k_x, k_w, k_b = jax.random.split(key, 3)

    B = 8  # small batch of fused feature vectors

    # Deterministic init mimicking nn.Linear's U(-1/sqrt(D), 1/sqrt(D)).
    bound = 1.0 / jnp.sqrt(jnp.float32(INPUT_DIM))
    # PyTorch layout: (out_features, in_features) = (2, 512)
    w_pt = jax.random.uniform(k_w, (NUM_CLASSES, INPUT_DIM), jnp.float32, -bound, bound)
    b = jax.random.uniform(k_b, (NUM_CLASSES,), jnp.float32, -bound, bound)

    x = jax.random.normal(k_x, (B, INPUT_DIM), jnp.float32)

    out = question_filter_head(x, w_pt, b)
    out = jax.block_until_ready(out)

    # Cross-check against plain JAX reference of the PyTorch forward.
    ref = x @ w_pt.T + b
    assert out.shape == (B, NUM_CLASSES)
    assert jnp.allclose(out, ref, atol=1e-5, rtol=1e-5)

    print("KERNEL_OK")
</pallas_src>

<mosaic_0001>
module attributes {stable_mosaic.version = 11 : i64} {
  func.func @_linear_kernel(%arg0: i32, %arg1: memref<8x512xf32, #tpu.memory_space<vmem>>, %arg2: memref<128x512xf32, #tpu.memory_space<vmem>>, %arg3: memref<1x128xf32, #tpu.memory_space<vmem>>, %arg4: memref<8x128xf32, #tpu.memory_space<vmem>>) attributes {dimension_semantics = [#tpu.dimension_semantics<parallel>], iteration_bounds = array<i64: 1>, scalar_prefetch = 0 : i64, scratch_operands = 0 : i64, tpu.core_type = #tpu.core_type<tc>, window_params = [{transform_indices = @transform_0, window_bounds = array<i64: 8, 512>}, {pipeline_mode = #tpu.pipeline_mode<synchronous>, transform_indices = @transform_1, window_bounds = array<i64: 128, 512>}, {pipeline_mode = #tpu.pipeline_mode<synchronous>, transform_indices = @transform_2, window_bounds = array<i64: 1, 128>}, {transform_indices = @transform_3, window_bounds = array<i64: 8, 128>}]} {
    %c0 = arith.constant 0 : index
    %c0_0 = arith.constant 0 : index
    %0 = vector.load %arg1[%c0, %c0_0] : memref<8x512xf32, #tpu.memory_space<vmem>>, vector<8x512xf32>
    %c0_1 = arith.constant 0 : index
    %c0_2 = arith.constant 0 : index
    %1 = vector.load %arg2[%c0_1, %c0_2] : memref<128x512xf32, #tpu.memory_space<vmem>>, vector<128x512xf32>
    %cst = arith.constant dense<0.000000e+00> : vector<8x128xf32>
    %2 = tpu.matmul %0, %1, %cst {dimension_numbers = #tpu.dot_dimension_numbers<[1], [1], [0], [0], [0, 0, 1, 0], [], []>} : vector<8x512xf32>, vector<128x512xf32>, vector<8x128xf32> -> vector<8x128xf32>
    %c0_3 = arith.constant 0 : index
    %c0_4 = arith.constant 0 : index
    %3 = vector.load %arg3[%c0_3, %c0_4] : memref<1x128xf32, #tpu.memory_space<vmem>>, vector<1x128xf32>
    %4 = vector.broadcast %3 : vector<1x128xf32> to vector<8x128xf32>
    %5 = arith.addf %2, %4 : vector<8x128xf32>
    %c0_5 = arith.constant 0 : index
    %c0_6 = arith.constant 0 : index
    %6 = vector.load %arg4[%c0_5, %c0_6] : memref<8x128xf32, #tpu.memory_space<vmem>>, vector<8x128xf32>
    tpu.vector_store %arg4[%c0_5, %c0_6], %5 {strides = array<i32>} : memref<8x128xf32, #tpu.memory_space<vmem>>, vector<8x128xf32>,
    return
  }
  func.func @transform_0(%arg0: i32) -> (i32, i32) {
    %c0_i32 = arith.constant 0 : i32
    %c0_i32_0 = arith.constant 0 : i32
    return %arg0, %c0_i32 : i32, i32
  }
  func.func @transform_1(%arg0: i32) -> (i32, i32) {
    %c0_i32 = arith.constant 0 : i32
    %c0_i32_0 = arith.constant 0 : i32
    %c0_i32_1 = arith.constant 0 : i32
    return %c0_i32, %c0_i32_0 : i32, i32
  }
  func.func @transform_2(%arg0: i32) -> (i32, i32) {
    %c0_i32 = arith.constant 0 : i32
    %c0_i32_0 = arith.constant 0 : i32
    %c0_i32_1 = arith.constant 0 : i32
    return %c0_i32, %c0_i32_0 : i32, i32
  }
  func.func @transform_3(%arg0: i32) -> (i32, i32) {
    %c0_i32 = arith.constant 0 : i32
    %c0_i32_0 = arith.constant 0 : i32
    return %arg0, %c0_i32 : i32, i32
  }
}

</mosaic_0001>

<bundles_post_ra>
// kernel: tpu_custom_call.1
= control target key start
LH: loop header
LB: loop body
LE: loop exit
PB: predicated region body
PF: predicated region fallthrough
CT: control target
= control target key end

     0   :  { %8 = vsyncpa [#allocation3], 0  ;;  %s488_s0 = inlined_call_operand.hbm [shape: f32[8,512], index: 0, kind: input, shape index: {}]   ;;  %s489_s1 = inlined_call_operand.hbm [shape: f32[128,512], index: 1, kind: input, shape index: {}]   ;;  %s490_s2 = inlined_call_operand.vmem [shape: f32[1,128], index: 2, kind: input, shape index: {}]   ;;  %s491_s3 = inlined_call_operand.hbm [shape: f32[8,128], index: 3, kind: output, shape index: {}]  }
   0x1   :  { %9 = vsyncpa [#allocation6], 0 }
   0x2   :  { %10 = vsyncpa [#allocation4], 0  ;;  %s417_s12 = smov [#allocation2]   ;;  %s418_s14 = smov [#allocation5]  }
   0x3   :  { %s17_s13 = sshll.u32 %s417_s12, 4  ;;  %s26_s15 = sshll.u32 %s418_s14, 4  ;;  %s18_s13 = int_to_ptr.vmem [resolvable:$true] %s17_s13  ;;  %s442_s15 = int_to_ptr.vmem [resolvable:$true] %s26_s15 }
   0x4   :  { %s345_s18 = scalar_lea.hbm %s488_s0, 512 }
   0x5   :  { %p346_p0 = scmp.ne.s32.totalorder %s488_s0, %s345_s18  ;;  %p349_p1 = scmp.lt.u32.totalorder %s345_s18, %s488_s0 }
   0x7   :  { %p351_p2 = pnand %p349_p1, %p346_p0 }
   0x9   :  { %354 = shalt.err (!%p351_p2)
}
   0xa   :  { %s355_s23 = scalar_lea.vmem %s18_s13, 512  ;;  %p360_p4 = scmp.lt.s32.totalorder %s18_s13, %s18_s13 }
   0xb   :  { %p356_p3 = scmp.ne.s32.totalorder %s18_s13, %s355_s23  ;;  %p361_p5 = scmp.lt.s32.totalorder %s355_s23, %s355_s23 }
   0xd   :  { %p362_p6 = por %p361_p5, %p360_p4 }
   0xf   :  { %p363_p7 = pnand %p362_p6, %p356_p3 }
  0x11   :  { %366 = shalt.err (!%p363_p7)
}
  0x12   :  { %20 = dma.hbm_to_vmem [thread:$0]  %s488_s0, 512, %s18_s13, [#allocation3]  }
  0x13   :  { %s367_s28 = scalar_lea.hbm %s489_s1, 8192 }
  0x14   :  { %p368_p8 = scmp.ne.s32.totalorder %s489_s1, %s367_s28  ;;  %p371_p9 = scmp.lt.u32.totalorder %s367_s28, %s489_s1 }
  0x16   :  { %p373_p10 = pnand %p371_p9, %p368_p8 }
  0x18   :  { %376 = shalt.err (!%p373_p10)
}
  0x19   :  { %s377_s6 = scalar_lea.vmem %s442_s15, 8192  ;;  %p382_p12 = scmp.lt.s32.totalorder %s442_s15, %s442_s15 }
  0x1a   :  { %p378_p11 = scmp.ne.s32.totalorder %s442_s15, %s377_s6  ;;  %p383_p13 = scmp.lt.s32.totalorder %s377_s6, %s377_s6 }
  0x1c   :  { %p384_p0 = por %p383_p13, %p382_p12 }
  0x1e   :  { %p385_p1 = pnand %p384_p0, %p378_p11 }
  0x20   :  { %388 = shalt.err (!%p385_p1)
}
  0x21   :  { %s419_s0 = smov 512   ;;  %s420_s7 = smov 32  }
  0x22   :  { %32 = dma.hbm_to_vmem [thread:$0]  %s489_s1, 8192, %s442_s15, [#allocation6], %s419_s0, %s419_s0, %s420_s7  }
  0x23   :  { %411 = dma.done.wait [#allocation3], 512  }
  0x24   :  { %412 = vsyncadd [#allocation3], 4294966784 }
  0x25   :  { %413 = dma.done.wait [#allocation6], 8192  }
  0x26   :  { %414 = vsyncadd [#allocation6], 4294959104  ;;  %v46_v0 = vld [vmem:[#allocation5 + $0x8] sm:$0xff]  ;;  %v45_v2 = vld [vmem:[#allocation5] sm:$0xff]  ;;  %s421_s11 = smov [#allocation7]  }
  0x27   :  { %v50_v1 = vld [vmem:[#allocation5 + $0x28] sm:$0xff]  ;;  %v49_v4 = vld [vmem:[#allocation5 + $0x20] sm:$0xff]  ;;  %v48_v5 = vld [vmem:[#allocation5 + $0x18] sm:$0xff]  ;;  %s263_s12 = sshll.u32 %s421_s11, 4  ;;  %s264_s12 = int_to_ptr.vmem [resolvable:$true] %s263_s12 }
  0x28   :  { %v274_v3 = vpack.c.bf16 %v50_v1, %v46_v0  ;;  %v52_v6 = vld [vmem:[#allocation5 + $0x38] sm:$0xff]  ;;  %v276_v7 = vpack.c.bf16 %v49_v4, %v45_v2  ;;  %v47_v9 = vld [vmem:[#allocation5 + $0x10] sm:$0xff]  ;;  %v54_v11 = vld [vmem:[#allocation5 + $0x48] sm:$0xff]  ;;  %s389_s13 = scalar_lea.vmem %s264_s12, 128  ;;  %p394_p3 = scmp.lt.s32.totalorder %s264_s12, %s264_s12 }
  0x29   :  { %v306_v8 = vpack.c.bf16 %v52_v6, %v48_v5  ;;  %v51_v10 = vld [vmem:[#allocation5 + $0x30] sm:$0xff]  ;;  %v58_v13 = vld [vmem:[#allocation5 + $0x68] sm:$0xff]  ;;  %v56_v15 = vld [vmem:[#allocation5 + $0x58] sm:$0xff]  ;;  %p390_p2 = scmp.ne.s32.totalorder %s264_s12, %s389_s13  ;;  %p395_p4 = scmp.lt.s32.totalorder %s389_s13, %s389_s13 }
  0x2a   :  { %275 = vmatprep.subr.bf16.mxu1 %v274_v3  ;;  %v308_v12 = vpack.c.bf16 %v51_v10, %v47_v9  ;;  %v278_v14 = vpack.c.bf16 %v58_v13, %v54_v11  ;;  %v60_v16 = vld [vmem:[#allocation5 + $0x78] sm:$0xff]  ;;  %v53_v17 = vld [vmem:[#allocation5 + $0x40] sm:$0xff]  ;;  %v55_v20 = vld [vmem:[#allocation5 + $0x50] sm:$0xff] }
  0x2b   :  { %277 = vmatpush1.bf16.xpose.msra.mxu1 %v276_v7  ;;  %307 = vmatprep.subr.bf16.mxu0 %v306_v8  ;;  %v57_v18 = vld [vmem:[#allocation5 + $0x60] sm:$0xff]  ;;  %v310_v19 = vpack.c.bf16 %v60_v16, %v56_v15  ;;  %v59_v21 = vld [vmem:[#allocation5 + $0x70] sm:$0xff]  ;;  %v62_v22 = vld [vmem:[#allocation5 + $0x88] sm:$0xff]  ;;  %p396_p5 = por %p395_p4, %p394_p3 }
  0x2c   :  { %309 = vmatpush1.bf16.xpose.msra.mxu0 %v308_v12  ;;  %279 = vmatprep.subr.bf16.mxu1 %v278_v14  ;;  %v66_v23 = vld [vmem:[#allocation5 + $0xa8] sm:$0xff]  ;;  %v64_v24 = vld [vmem:[#allocation5 + $0x98] sm:$0xff]  ;;  %v280_v26 = vpack.c.bf16 %v57_v18, %v53_v17  ;;  %v312_v27 = vpack.c.bf16 %v59_v21, %v55_v20  ;;  %v61_v30 = vld [vmem:[#allocation5 + $0x80] sm:$0xff] }
  0x2d   :  { %311 = vmatprep.subr.bf16.mxu0 %v310_v19  ;;  %v68_v25 = vld [vmem:[#allocation5 + $0xb8] sm:$0xff]  ;;  %v282_v28 = vpack.c.bf16 %v66_v23, %v62_v22  ;;  %v65_v31 = vld [vmem:[#allocation5 + $0xa0] sm:$0xff]  ;;  %v63_v32 = vld [vmem:[#allocation5 + $0x90] sm:$0xff]  ;;  %p397_p6 = pnand %p396_p5, %p390_p2 }
  0x2e   :  { %v314_v29 = vpack.c.bf16 %v68_v25, %v64_v24  ;;  %v67_v33 = vld [vmem:[#allocation5 + $0xb0] sm:$0xff]  ;;  %v70_v34 = vld [vmem:[#allocation5 + $0xc8] sm:$0xff]  ;;  %v72_v36 = vld [vmem:[#allocation5 + $0xd8] sm:$0xff]  ;;  %v284_v38 = vpack.c.bf16 %v65_v31, %v61_v30 }
  0x2f   :  { %v74_v35 = vld [vmem:[#allocation5 + $0xe8] sm:$0xff]  ;;  %v76_v37 = vld [vmem:[#allocation5 + $0xf8] sm:$0xff]  ;;  %v316_v39 = vpack.c.bf16 %v67_v33, %v63_v32  ;;  %v69_v42 = vld [vmem:[#allocation5 + $0xc0] sm:$0xff] }
  0x30   :  { %v286_v40 = vpack.c.bf16 %v74_v35, %v70_v34  ;;  %v318_v41 = vpack.c.bf16 %v76_v37, %v72_v36  ;;  %v73_v43 = vld [vmem:[#allocation5 + $0xe0] sm:$0xff]  ;;  %v71_v44 = vld [vmem:[#allocation5 + $0xd0] sm:$0xff]  ;;  %v42_v46 = vld [vmem:[#allocation2 + $0x8] sm:$0xff] }
  0x31   :  { %v75_v45 = vld [vmem:[#allocation5 + $0xf0] sm:$0xff]  ;;  %v78_v47 = vld [vmem:[#allocation5 + $0x108] sm:$0xff]  ;;  %180 = vmatprep.mubr.f32.mxu1 %v42_v46  ;;  %v44_v49 = vld [vmem:[#allocation2 + $0x18] sm:$0xff]  ;;  %v288_v52 = vpack.c.bf16 %v73_v43, %v69_v42 }
  0x32   :  { %v82_v48 = vld [vmem:[#allocation5 + $0x128] sm:$0xff]  ;;  %v80_v50 = vld [vmem:[#allocation5 + $0x118] sm:$0xff]  ;;  %250 = vmatprep.mubr.f32.mxu0 %v44_v49  ;;  %v320_v53 = vpack.c.bf16 %v75_v45, %v71_v44  ;;  %v77_v56 = vld [vmem:[#allocation5 + $0x100] sm:$0xff] }
  0x33   :  { %281 = vmatpush1.bf16.xpose.msra.mxu1 %v280_v26  ;;  %v84_v51 = vld [vmem:[#allocation5 + $0x138] sm:$0xff]  ;;  %v290_v54 = vpack.c.bf16 %v82_v48, %v78_v47  ;;  %v81_v57 = vld [vmem:[#allocation5 + $0x120] sm:$0xff]  ;;  %v79_v58 = vld [vmem:[#allocation5 + $0x110] sm:$0xff] }
  0x34   :  { %313 = vmatpush1.bf16.xpose.msra.mxu0 %v312_v27  ;;  %283 = vmatprep.subr.bf16.mxu1 %v282_v28  ;;  %v322_v55 = vpack.c.bf16 %v84_v51, %v80_v50  ;;  %v83_v59 = vld [vmem:[#allocation5 + $0x130] sm:$0xff]  ;;  %v86_v60 = vld [vmem:[#allocation5 + $0x148] sm:$0xff]  ;;  %v88_v62 = vld [vmem:[#allocation5 + $0x158] sm:$0xff]  ;;  %v292_v0 = vpack.c.bf16 %v81_v57, %v77_v56 }
  0x35   :  { %315 = vmatprep.subr.bf16.mxu0 %v314_v29  ;;  %v90_v61 = vld [vmem:[#allocation5 + $0x168] sm:$0xff]  ;;  %v92_v63 = vld [vmem:[#allocation5 + $0x178] sm:$0xff]  ;;  %v324_v1 = vpack.c.bf16 %v83_v59, %v79_v58  ;;  %v85_v4 = vld [vmem:[#allocation5 + $0x140] sm:$0xff] }
  0x36   :  { %v294_v2 = vpack.c.bf16 %v90_v61, %v86_v60  ;;  %v326_v3 = vpack.c.bf16 %v92_v63, %v88_v62  ;;  %v89_v5 = vld [vmem:[#allocation5 + $0x160] sm:$0xff]  ;;  %v87_v6 = vld [vmem:[#allocation5 + $0x150] sm:$0xff]  ;;  %v94_v8 = vld [vmem:[#allocation5 + $0x188] sm:$0xff] }
  0x37   :  { %v91_v7 = vld [vmem:[#allocation5 + $0x170] sm:$0xff]  ;;  %v98_v9 = vld [vmem:[#allocation5 + $0x1a8] sm:$0xff]  ;;  %v96_v10 = vld [vmem:[#allocation5 + $0x198] sm:$0xff]  ;;  %v296_v12 = vpack.c.bf16 %v89_v5, %v85_v4 }
  0x38   :  { %v100_v11 = vld [vmem:[#allocation5 + $0x1b8] sm:$0xff]  ;;  %v328_v13 = vpack.c.bf16 %v91_v7, %v87_v6  ;;  %v298_v14 = vpack.c.bf16 %v98_v9, %v94_v8  ;;  %v93_v16 = vld [vmem:[#allocation5 + $0x180] sm:$0xff]  ;;  %v95_v18 = vld [vmem:[#allocation5 + $0x190] sm:$0xff] }
  0x39   :  { %v330_v15 = vpack.c.bf16 %v100_v11, %v96_v10  ;;  %v97_v17 = vld [vmem:[#allocation5 + $0x1a0] sm:$0xff]  ;;  %v99_v19 = vld [vmem:[#allocation5 + $0x1b0] sm:$0xff]  ;;  %v102_v20 = vld [vmem:[#allocation5 + $0x1c8] sm:$0xff] }
  0x3a   :  { %v106_v21 = vld [vmem:[#allocation5 + $0x1e8] sm:$0xff]  ;;  %v104_v22 = vld [vmem:[#allocation5 + $0x1d8] sm:$0xff]  ;;  %v300_v24 = vpack.c.bf16 %v97_v17, %v93_v16  ;;  %v332_v25 = vpack.c.bf16 %v99_v19, %v95_v18  ;;  %v101_v28 = vld [vmem:[#allocation5 + $0x1c0] sm:$0xff] }
  0x3b   :  { %285 = vmatpush1.bf16.xpose.msra.mxu1 %v284_v38  ;;  %v108_v23 = vld [vmem:[#allocation5 + $0x1f8] sm:$0xff]  ;;  %v302_v26 = vpack.c.bf16 %v106_v21, %v102_v20  ;;  %v105_v29 = vld [vmem:[#allocation5 + $0x1e0] sm:$0xff]  ;;  %v103_v30 = vld [vmem:[#allocation5 + $0x1d0] sm:$0xff] }
  0x3c   :  { %317 = vmatpush1.bf16.xpose.msra.mxu0 %v316_v39  ;;  %287 = vmatprep.subr.bf16.mxu1 %v286_v40  ;;  %v334_v27 = vpack.c.bf16 %v108_v23, %v104_v22  ;;  %v107_v31 = vld [vmem:[#allocation5 + $0x1f0] sm:$0xff]  ;;  %v304_v32 = vpack.c.bf16 %v105_v29, %v101_v28  ;;  %v41_v34 = vld [vmem:[#allocation2] sm:$0xff] }
  0x3d   :  { %319 = vmatprep.subr.bf16.mxu0 %v318_v41  ;;  %v336_v33 = vpack.c.bf16 %v107_v31, %v103_v30  ;;  %v43_v35 = vld [vmem:[#allocation2 + $0x10] sm:$0xff]  ;;  %v273_v36 = vld [vmem:[%s490_s2] ss:$0 sm:$0xff] }
  0x43   :  { %289 = vmatpush1.bf16.xpose.msra.mxu1 %v288_v52 }
  0x44   :  { %321 = vmatpush1.bf16.xpose.msra.mxu0 %v320_v53  ;;  %291 = vmatprep.subr.bf16.mxu1 %v290_v54 }
  0x45   :  { %323 = vmatprep.subr.bf16.mxu0 %v322_v55 }
  0x4b   :  { %293 = vmatpush1.bf16.xpose.msra.mxu1 %v292_v0 }
  0x4c   :  { %325 = vmatpush1.bf16.xpose.msra.mxu0 %v324_v1  ;;  %295 = vmatprep.subr.bf16.mxu1 %v294_v2 }
  0x4d   :  { %327 = vmatprep.subr.bf16.mxu0 %v326_v3 }
  0x53   :  { %297 = vmatpush1.bf16.xpose.msra.mxu1 %v296_v12 }
  0x54   :  { %329 = vmatpush1.bf16.xpose.msra.mxu0 %v328_v13  ;;  %299 = vmatprep.subr.bf16.mxu1 %v298_v14 }
  0x55   :  { %331 = vmatprep.subr.bf16.mxu0 %v330_v15 }
  0x5b   :  { %301 = vmatpush1.bf16.xpose.msra.mxu1 %v300_v24 }
  0x5c   :  { %333 = vmatpush1.bf16.xpose.msra.mxu0 %v332_v25  ;;  %303 = vmatprep.subr.bf16.mxu1 %v302_v26 }
  0x5d   :  { %335 = vmatprep.subr.bf16.mxu0 %v334_v27 }
  0x63   :  { %305 = vmatpush1.bf16.xpose.msra.mxu1 %v304_v32 }
  0x64   :  { %337 = vmatpush1.bf16.xpose.msra.mxu0 %v336_v33 }
  0x6a   :  { %181 = vmatmul.mubr.f32.vlgmr.msra.gmra.mrb[0].mxu1 %v41_v34 }
  0x6b   :  { %251 = vmatmul.mubr.f32.vlgmr.msra.gmra.mrb[0].mxu0 %v43_v35 }
 0x13d   :  { %v182_v37 = vpop.f32.mrb[0].mxu1 }
 0x13e   :  { %v183_v38 = vadd.f32 %v273_v36, %v182_v37  ;;  %v184_v39 = vpop.f32.mrb[1].mxu1  ;;  %v252_v40 = vpop.f32.mrb[0].mxu0 }
 0x13f   :  { %v254_v41 = vpop.f32.mrb[1].mxu0 }
 0x140   :  { %v253_v42 = vadd.f32 %v252_v40, %v183_v38 }
 0x142   :  { %256 = vst [vmem:[#allocation7] sm:$0xff] %v253_v42 }
 0x143   :  { %400 = shalt.err (!%p397_p6)
}
 0x144   :  { %s401_s2 = scalar_lea.hbm %s491_s3, 128 }
 0x145   :  { %p402_p7 = scmp.ne.s32.totalorder %s491_s3, %s401_s2  ;;  %p405_p8 = scmp.lt.u32.totalorder %s401_s2, %s491_s3 }
 0x147   :  { %p407_p9 = pnand %p405_p8, %p402_p7 }
 0x149   :  { %410 = shalt.err (!%p407_p9)
}
 0x14a   :  { %266 = dma.vmem_to_hbm [thread:$0]  %s264_s12, 128, %s491_s3, [#allocation4]  }
 0x14b   :  { %415 = dma.done.wait [#allocation4], 128  }
 0x14c   :  { %416 = vsyncadd [#allocation4], 4294967168 }
 0x14d   :  { %270 = vsyncpa [#allocation3], 1 }
 0x14e   :  { %271 = vsyncpa [#allocation6], 1 }
 0x14f   :  { %272 = vsyncpa [#allocation4], 1 }

</bundles_post_ra>
